<compile_context>
chip_gen: v7x
topology: tpu7x:2x2x1
jax: 0.10.0
libtpu: 0.0.40
codegen_flags: <defaults>
</compile_context>

<pallas_src>
import functools
from math import sqrt

import jax
import jax.numpy as jnp
from jax import lax
from jax.experimental import pallas as pl
from jax.experimental.pallas import tpu as pltpu


# ------------------------------ shared helpers -------------------------------

def _layer_norm(x, gamma, beta, eps=1e-5):
    # PyTorch nn.LayerNorm: biased variance over the last dim, eps inside rsqrt.
    mean = jnp.mean(x, axis=-1, keepdims=True)
    var = jnp.mean((x - mean) ** 2, axis=-1, keepdims=True)
    return (x - mean) * lax.rsqrt(var + eps) * gamma + beta


def _gelu_exact(x):
    # nn.GELU() default (exact, erf-based).
    return 0.5 * x * (1.0 + lax.erf(x * (1.0 / sqrt(2.0))))


_RESIDENT = pl.BlockSpec(memory_space=pltpu.MemorySpace.VMEM)


def _vmem_limit_bytes():
    # Derive the scoped-VMEM budget from the actual part (v5e/v6e: 128 MiB,
    # v7x: 64 MiB per TensorCore) instead of hard-coding a 128-MiB-part number.
    try:
        cap = int(pltpu.get_tpu_info().vmem_capacity_bytes)
    except Exception:
        cap = 64 * 1024 * 1024
    return min((cap * 3) // 4, 96 * 1024 * 1024)


def _pick_seq_block(S, target):
    if S <= target:
        return S
    b = (target // 8) * 8
    while b >= 8:
        if S % b == 0:
            return b
        b -= 8
    return S


def _pick_lane_block(N, target):
    if N <= target:
        return N
    b = (target // 128) * 128
    while b >= 128:
        if N % b == 0:
            return b
        b -= 128
    return N


def _pick_group_width(H, head_dim, target):
    # Head-group lane width: a multiple of head_dim that divides H and is either a
    # multiple of 128 lanes or the full H (BlockSpec lane constraint).
    cands = []
    g = head_dim
    while g <= H:
        if H % g == 0 and (g % 128 == 0 or g == H):
            cands.append(g)
        g += head_dim
    for c in cands:
        if c >= min(target, H):
            return c
    return cands[-1]


# --------------------- kernel 1: LayerNorm1 + QKV projection -----------------

def _ln1_qkv_kernel(x_ref, g_ref, b_ref, wq_ref, bq_ref, wk_ref, bk_ref,
                    wv_ref, bv_ref, q_ref, k_ref, v_ref, *, scale, compute_dtype):
    h1 = _layer_norm(x_ref[...], g_ref[...], b_ref[...]).astype(compute_dtype)
    q = jnp.dot(h1, wq_ref[...], preferred_element_type=jnp.float32) + bq_ref[...]
    k = jnp.dot(h1, wk_ref[...], preferred_element_type=jnp.float32) + bk_ref[...]
    v = jnp.dot(h1, wv_ref[...], preferred_element_type=jnp.float32) + bv_ref[...]
    q_ref[...] = (q * scale).astype(q_ref.dtype)   # fold 1/sqrt(head_dim) into q
    k_ref[...] = k.astype(k_ref.dtype)
    v_ref[...] = v.astype(v_ref.dtype)


def _ln1_qkv(x, params, *, scale, block, compute_dtype, vmem_limit):
    B, S, H = x.shape
    cd = compute_dtype
    cd_sz = jnp.dtype(cd).itemsize
    x_sz = x.dtype.itemsize
    n_s = S // block
    seq_spec = pl.BlockSpec((pl.Squeezed(), block, H), lambda b, i: (b, i, 0))
    kernel = functools.partial(_ln1_qkv_kernel, scale=scale, compute_dtype=cd)
    out_sds = jax.ShapeDtypeStruct((B, S, H), cd)
    cost = pl.CostEstimate(
        flops=int(6 * B * S * H * H),
        transcendentals=int(B * S),
        bytes_accessed=int(B * S * H * (x_sz + 3 * cd_sz) + 3 * H * H * cd_sz + 8 * H * 4),
    )
    return pl.pallas_call(
        kernel,
        out_shape=(out_sds, out_sds, out_sds),
        grid_spec=pltpu.PrefetchScalarGridSpec(
            num_scalar_prefetch=0,
            grid=(B, n_s),
            in_specs=[seq_spec] + [_RESIDENT] * 8,
            out_specs=[seq_spec, seq_spec, seq_spec]),
        compiler_params=pltpu.CompilerParams(
            dimension_semantics=("parallel", "parallel"),
            vmem_limit_bytes=vmem_limit),
        cost_estimate=cost,
    )(x, params["ln1_g"], params["ln1_b"],
      params["wq"].astype(cd), params["bq"],
      params["wk"].astype(cd), params["bk"],
      params["wv"].astype(cd), params["bv"])


# ------------- kernel 2: flash attention + output proj + residual ------------

def _flash_attn_kernel(x_ref, q_ref, k_ref, v_ref, wo_ref, bo_ref, o_ref,
                       m_scr, l_scr, ctx_scr, cat_scr, attn_scr,
                       *, head_dim, heads_per_group, compute_dtype, exact_recip):
    gi = pl.program_id(2)            # head-group index
    ki = pl.program_id(3)            # kv-tile index (innermost)
    ngroups = pl.num_programs(2)
    nkv = pl.num_programs(3)
    hd, G = head_dim, heads_per_group
    gw = G * hd

    @pl.when(jnp.logical_and(gi == 0, ki == 0))
    def _zero_attn_acc():
        attn_scr[...] = jnp.zeros_like(attn_scr)

    @pl.when(ki == 0)
    def _init_group():
        m_scr[...] = jnp.full_like(m_scr, -jnp.inf)
        l_scr[...] = jnp.zeros_like(l_scr)
        ctx_scr[...] = jnp.zeros_like(ctx_scr)

    q_tile = q_ref[...]          # [block_q,  gw], pre-scaled by 1/sqrt(hd)
    k_tile = k_ref[...]          # [block_kv, gw]
    v_tile = v_ref[...]          # [block_kv, gw]

    # Online softmax per head in this group: static lane slices, 2-D MXU matmuls,
    # f32 statistics. G is a small static int, so this loop unrolls.
    for h in range(G):
        lo = h * hd
        qh = q_tile[:, lo:lo + hd]
        kh = k_tile[:, lo:lo + hd]
        vh = v_tile[:, lo:lo + hd]
        s = jnp.einsum("qd,kd->qk", qh, kh, preferred_element_type=jnp.float32)
        m_prev = m_scr[h]
        m_new = jnp.maximum(m_prev, jnp.max(s, axis=-1, keepdims=True))
        alpha = jnp.exp(m_prev - m_new)
        p = jnp.exp(s - m_new)   # f32 exp (safe on v5e; bf16 EUP path optional on v6e/v7x)
        # TODO(synk): the row-sum could be folded into the p@v matmul (ones column)
        # to move this XLU reduction onto MXU slack if profiling shows XLU saturation.
        l_scr[h] = alpha * l_scr[h] + jnp.sum(p, axis=-1, keepdims=True)
        ctx_scr[h] = alpha * ctx_scr[h] + jnp.dot(
            p.astype(compute_dtype), vh, preferred_element_type=jnp.float32)
        m_scr[h] = m_new

    # End of the KV loop for this head group: normalize, concatenate along lanes
    # (into a VMEM scratch, no transposes) and fold through this group's Wo rows.
    @pl.when(ki == nkv - 1)
    def _finish_group():
        for h in range(G):
            lo = h * hd
            if exact_recip:
                ctx_h = ctx_scr[h] / l_scr[h]
            else:
                ctx_h = ctx_scr[h] * pl.reciprocal(l_scr[h], approx=True)
            cat_scr[:, lo:lo + hd] = ctx_h.astype(cat_scr.dtype)
        if wo_ref.shape[0] == gw:                 # single group: whole Wo
            wo_g = wo_ref[...]
        else:
            row0 = pl.multiple_of(gi * gw, gw)
            wo_g = wo_ref[pl.ds(row0, gw), :]     # [gw, H] rows for this head group
        attn_scr[...] += jnp.dot(cat_scr[...], wo_g, preferred_element_type=jnp.float32)

    # End of all head groups: attention residual, write x1.
    @pl.when(jnp.logical_and(gi == ngroups - 1, ki == nkv - 1))
    def _finalize():
        o_ref[...] = (x_ref[...] + attn_scr[...] + bo_ref[...]).astype(o_ref.dtype)


def _attention(x, q, k, v, params, *, num_heads, block_q, block_kv, group_width,
               compute_dtype, vmem_limit):
    B, S, H = x.shape
    hd = H // num_heads
    G = group_width // hd
    ngroups = H // group_width
    nq, nkv = S // block_q, S // block_kv
    cd = compute_dtype
    cd_sz = jnp.dtype(cd).itemsize
    x_sz = x.dtype.itemsize
    exact_recip = jnp.dtype(cd) == jnp.dtype(jnp.float32)

    x_spec = pl.BlockSpec((pl.Squeezed(), block_q, H), lambda b, qi, gi, ki: (b, qi, 0))
    q_spec = pl.BlockSpec((pl.Squeezed(), block_q, group_width),
                          lambda b, qi, gi, ki: (b, qi, gi))
    kv_spec = pl.BlockSpec((pl.Squeezed(), block_kv, group_width),
                           lambda b, qi, gi, ki: (b, ki, gi))
    out_spec = pl.BlockSpec((pl.Squeezed(), block_q, H), lambda b, qi, gi, ki: (b, qi, 0))

    kernel = functools.partial(
        _flash_attn_kernel, head_dim=hd, heads_per_group=G,
        compute_dtype=cd, exact_recip=exact_recip)
    cost = pl.CostEstimate(
        flops=int(4 * B * num_heads * S * S * hd + 2 * B * S * H * H),
        transcendentals=int(2 * B * num_heads * S * S),
        bytes_accessed=int(2 * B * S * H * x_sz + B * S * H * cd_sz
                           + 2 * nq * B * S * H * cd_sz + H * H * cd_sz + H * 4),
    )
    return pl.pallas_call(
        kernel,
        out_shape=jax.ShapeDtypeStruct((B, S, H), x.dtype),
        grid_spec=pltpu.PrefetchScalarGridSpec(
            num_scalar_prefetch=0,
            grid=(B, nq, ngroups, nkv),
            in_specs=[x_spec, q_spec, kv_spec, kv_spec, _RESIDENT, _RESIDENT],
            out_specs=out_spec,
            scratch_shapes=[
                pltpu.VMEM((G, block_q, 1), jnp.float32),    # running row max
                pltpu.VMEM((G, block_q, 1), jnp.float32),    # running row sum
                pltpu.VMEM((G, block_q, hd), jnp.float32),   # un-normalized context
                pltpu.VMEM((block_q, group_width), cd),      # normalized ctx, lane-concat
                pltpu.VMEM((block_q, H), jnp.float32),       # attention-output accumulator
            ]),
        compiler_params=pltpu.CompilerParams(
            dimension_semantics=("parallel", "parallel", "arbitrary", "arbitrary"),
            vmem_limit_bytes=vmem_limit),
        cost_estimate=cost,
    )(x, q, k, v, params["wo"].astype(cd), params["bo"])


# --------------- kernel 3: LayerNorm2 + FFN (blocked over I) + residual ------

def _ffn_kernel(x1_ref, g_ref, b_ref, w1_ref, b1_ref, w2_ref, b2_ref, o_ref,
                h2_scr, acc_scr, *, compute_dtype):
    ii = pl.program_id(2)
    ni = pl.num_programs(2)

    @pl.when(ii == 0)
    def _init():
        h2_scr[...] = _layer_norm(x1_ref[...], g_ref[...], b_ref[...]).astype(h2_scr.dtype)
        acc_scr[...] = jnp.zeros_like(acc_scr)

    ff = jnp.dot(h2_scr[...], w1_ref[...], preferred_element_type=jnp.float32) + b1_ref[...]
    ff = _gelu_exact(ff)
    acc_scr[...] += jnp.dot(ff.astype(compute_dtype), w2_ref[...],
                            preferred_element_type=jnp.float32)

    @pl.when(ii == ni - 1)
    def _finalize():
        # TODO(synk): nn.Dropout(hidden_dropout_prob) is identity in eval mode; no RNG applied.
        o_ref[...] = (acc_scr[...] + b2_ref[...] + x1_ref[...]).astype(o_ref.dtype)


def _ffn(x1, params, *, block_s, block_i, compute_dtype, vmem_limit):
    B, S, H = x1.shape
    I = params["w1"].shape[-1]
    ns, ni = S // block_s, I // block_i
    cd = compute_dtype
    cd_sz = jnp.dtype(cd).itemsize
    x_sz = x1.dtype.itemsize

    x_spec = pl.BlockSpec((pl.Squeezed(), block_s, H), lambda b, si, ii: (b, si, 0))
    w1_spec = pl.BlockSpec((H, block_i), lambda b, si, ii: (0, ii))
    b1_spec = pl.BlockSpec((1, block_i), lambda b, si, ii: (0, ii))
    w2_spec = pl.BlockSpec((block_i, H), lambda b, si, ii: (ii, 0))

    kernel = functools.partial(_ffn_kernel, compute_dtype=cd)
    cost = pl.CostEstimate(
        flops=int(4 * B * S * H * I),
        transcendentals=int(B * S * I + B * S),
        bytes_accessed=int(2 * B * S * H * x_sz + 2 * H * I * cd_sz + (I + 3 * H) * 4),
    )
    return pl.pallas_call(
        kernel,
        out_shape=jax.ShapeDtypeStruct((B, S, H), x1.dtype),
        grid_spec=pltpu.PrefetchScalarGridSpec(
            num_scalar_prefetch=0,
            grid=(B, ns, ni),
            in_specs=[x_spec, _RESIDENT, _RESIDENT, w1_spec, b1_spec, w2_spec, _RESIDENT],
            out_specs=x_spec,
            scratch_shapes=[
                pltpu.VMEM((block_s, H), cd),           # LN2(x1), computed once per seq tile
                pltpu.VMEM((block_s, H), jnp.float32),  # FFN output accumulator
            ]),
        compiler_params=pltpu.CompilerParams(
            dimension_semantics=("parallel", "parallel", "arbitrary"),
            vmem_limit_bytes=vmem_limit),
        cost_estimate=cost,
    )(x1, params["ln2_g"], params["ln2_b"],
      params["w1"].astype(cd), params["b1"], params["w2"].astype(cd), params["b2"])


# --------------------------------- top level ---------------------------------

def transformer_encoder_layer(x, params, num_heads, *, block_q=None, block_kv=None,
                              block_i=None, group_width=None,
                              compute_dtype=jnp.float32):
    B, S, H = x.shape
    assert H % num_heads == 0
    hd = H // num_heads
    vmem_limit = _vmem_limit_bytes()

    if block_q is None:
        block_q = _pick_seq_block(S, 256)
    if block_kv is None:
        block_kv = _pick_seq_block(S, 512)
    if group_width is None:
        group_width = _pick_group_width(H, hd, 256)
    I = params["w1"].shape[-1]
    if block_i is None:
        block_i = _pick_lane_block(I, 512)
    block_p = _pick_seq_block(S, 512)
    block_f = _pick_seq_block(S, 256)

    assert S % block_q == 0 and S % block_kv == 0 and S % block_p == 0 and S % block_f == 0
    assert H % group_width == 0 and group_width % hd == 0
    assert I % block_i == 0

    # 1) LayerNorm1 + Q/K/V projections (full-width matmuls, computed once per token).
    q, k, v = _ln1_qkv(x, params, scale=1.0 / sqrt(hd), block=block_p,
                       compute_dtype=compute_dtype, vmem_limit=vmem_limit)
    # 2) Flash attention over head groups + output projection + residual -> x1.
    x1 = _attention(x, q, k, v, params, num_heads=num_heads, block_q=block_q,
                    block_kv=block_kv, group_width=group_width,
                    compute_dtype=compute_dtype, vmem_limit=vmem_limit)
    # 3) LayerNorm2 + FFN (blocked over the intermediate dim) + residual.
    return _ffn(x1, params, block_s=block_f, block_i=block_i,
                compute_dtype=compute_dtype, vmem_limit=vmem_limit)


# ----------------------------- pure-JAX reference ----------------------------

def reference(x, params, num_heads):
    def ln(z, g, b):
        mu = jnp.mean(z, axis=-1, keepdims=True)
        var = jnp.mean((z - mu) ** 2, axis=-1, keepdims=True)
        return (z - mu) / jnp.sqrt(var + 1e-5) * g + b

    B, S, H = x.shape
    d = H // num_heads
    h = ln(x, params["ln1_g"][0], params["ln1_b"][0])
    q = h @ params["wq"] + params["bq"][0]
    k = h @ params["wk"] + params["bk"][0]
    v = h @ params["wv"] + params["bv"][0]
    ctxs = []
    for i in range(num_heads):
        qi, ki, vi = (t[..., i * d:(i + 1) * d] for t in (q, k, v))
        sc = jnp.einsum("bqd,bkd->bqk", qi, ki) / sqrt(d)
        w = jax.nn.softmax(sc, axis=-1)
        ctxs.append(jnp.einsum("bqk,bkd->bqd", w, vi))
    ctx = jnp.concatenate(ctxs, axis=-1)
    x1 = x + ctx @ params["wo"] + params["bo"][0]
    h2 = ln(x1, params["ln2_g"][0], params["ln2_b"][0])
    ff = h2 @ params["w1"] + params["b1"][0]
    ff = 0.5 * ff * (1.0 + lax.erf(ff / sqrt(2.0)))
    ff = ff @ params["w2"] + params["b2"][0]
    return ff + x1


# ----------------------------------- main ------------------------------------

if __name__ == "__main__":
    B, S, H, NUM_HEADS, I = 2, 8, 32, 4, 64
    keys = jax.random.split(jax.random.PRNGKey(0), 13)

    def init(k, shape, scale=0.05):
        return (scale * jax.random.normal(k, shape)).astype(jnp.float32)

    # Weights stored as [in, out] (transposed vs. PyTorch) so the kernel does x @ W.
    # Per-head q/k/v projections are concatenated along the output dimension,
    # matching torch.cat([...heads...], dim=-1) ordering.
    params = {
        "ln1_g": jnp.ones((1, H), jnp.float32),
        "ln1_b": jnp.zeros((1, H), jnp.float32),
        "ln2_g": jnp.ones((1, H), jnp.float32),
        "ln2_b": jnp.zeros((1, H), jnp.float32),
        "wq": init(keys[0], (H, H)), "bq": init(keys[1], (1, H)),
        "wk": init(keys[2], (H, H)), "bk": init(keys[3], (1, H)),
        "wv": init(keys[4], (H, H)), "bv": init(keys[5], (1, H)),
        "wo": init(keys[6], (H, H)), "bo": init(keys[7], (1, H)),
        "w1": init(keys[8], (H, I)), "b1": init(keys[9], (1, I)),
        "w2": init(keys[10], (I, H)), "b2": init(keys[11], (1, H)),
    }
    x = jax.random.normal(keys[12], (B, S, H), dtype=jnp.float32)

    ref = jax.block_until_ready(reference(x, params, NUM_HEADS))

    # f32 MXU path: exact softmax normalization, matches the reference tightly.
    out = jax.block_until_ready(
        transformer_encoder_layer(x, params, NUM_HEADS, compute_dtype=jnp.float32))
    assert out.shape == (B, S, H)
    err = float(jnp.max(jnp.abs(out - ref)))
    assert jnp.allclose(out, ref, rtol=2e-3, atol=2e-3), f"f32 max abs err = {err}"

    # bf16 MXU fast path (v6e/v7x): f32 accumulation + f32 LN/softmax statistics,
    # only bf16 operand-rounding error remains -> looser tolerance.
    out_bf16 = jax.block_until_ready(
        transformer_encoder_layer(x, params, NUM_HEADS, compute_dtype=jnp.bfloat16))
    err16 = float(jnp.max(jnp.abs(out_bf16 - ref)))
    assert jnp.allclose(out_bf16, ref, rtol=3e-2, atol=3e-2), f"bf16 max abs err = {err16}"

    print("KERNEL_OK")
</pallas_src>

<mosaic_0001>
module attributes {stable_mosaic.version = 11 : i64} {
  func.func @_ln1_qkv_kernel(%arg0: i32, %arg1: i32, %arg2: memref<1x8x32xf32, #tpu.memory_space<vmem>>, %arg3: memref<1x32xf32, #tpu.memory_space<vmem>>, %arg4: memref<1x32xf32, #tpu.memory_space<vmem>>, %arg5: memref<32x32xf32, #tpu.memory_space<vmem>>, %arg6: memref<1x32xf32, #tpu.memory_space<vmem>>, %arg7: memref<32x32xf32, #tpu.memory_space<vmem>>, %arg8: memref<1x32xf32, #tpu.memory_space<vmem>>, %arg9: memref<32x32xf32, #tpu.memory_space<vmem>>, %arg10: memref<1x32xf32, #tpu.memory_space<vmem>>, %arg11: memref<1x8x32xf32, #tpu.memory_space<vmem>>, %arg12: memref<1x8x32xf32, #tpu.memory_space<vmem>>, %arg13: memref<1x8x32xf32, #tpu.memory_space<vmem>>) attributes {dimension_semantics = [#tpu.dimension_semantics<parallel>, #tpu.dimension_semantics<parallel>], iteration_bounds = array<i64: 2, 1>, scalar_prefetch = 0 : i64, scratch_operands = 0 : i64, tpu.core_type = #tpu.core_type<tc>, window_params = [{transform_indices = @transform_0, window_bounds = array<i64: 1, 8, 32>}, {pipeline_mode = #tpu.pipeline_mode<synchronous>, transform_indices = @transform_1, window_bounds = array<i64: 1, 32>}, {pipeline_mode = #tpu.pipeline_mode<synchronous>, transform_indices = @transform_2, window_bounds = array<i64: 1, 32>}, {pipeline_mode = #tpu.pipeline_mode<synchronous>, transform_indices = @transform_3, window_bounds = array<i64: 32, 32>}, {pipeline_mode = #tpu.pipeline_mode<synchronous>, transform_indices = @transform_4, window_bounds = array<i64: 1, 32>}, {pipeline_mode = #tpu.pipeline_mode<synchronous>, transform_indices = @transform_5, window_bounds = array<i64: 32, 32>}, {pipeline_mode = #tpu.pipeline_mode<synchronous>, transform_indices = @transform_6, window_bounds = array<i64: 1, 32>}, {pipeline_mode = #tpu.pipeline_mode<synchronous>, transform_indices = @transform_7, window_bounds = array<i64: 32, 32>}, {pipeline_mode = #tpu.pipeline_mode<synchronous>, transform_indices = @transform_8, window_bounds = array<i64: 1, 32>}, {transform_indices = @transform_9, window_bounds = array<i64: 1, 8, 32>}, {transform_indices = @transform_10, window_bounds = array<i64: 1, 8, 32>}, {transform_indices = @transform_11, window_bounds = array<i64: 1, 8, 32>}]} {
    %c0 = arith.constant 0 : index
    %c0_0 = arith.constant 0 : index
    %c0_1 = arith.constant 0 : index
    %0 = vector.load %arg2[%c0, %c0_0, %c0_1] : memref<1x8x32xf32, #tpu.memory_space<vmem>>, vector<1x8x32xf32>
    %1 = vector.shape_cast %0 : vector<1x8x32xf32> to vector<8x32xf32>
    %c0_2 = arith.constant 0 : index
    %c0_3 = arith.constant 0 : index
    %2 = vector.load %arg3[%c0_2, %c0_3] : memref<1x32xf32, #tpu.memory_space<vmem>>, vector<1x32xf32>
    %c0_4 = arith.constant 0 : index
    %c0_5 = arith.constant 0 : index
    %3 = vector.load %arg4[%c0_4, %c0_5] : memref<1x32xf32, #tpu.memory_space<vmem>>, vector<1x32xf32>
    %cst = arith.constant dense<0.000000e+00> : vector<8xf32>
    %4 = vector.multi_reduction <add>, %1, %cst [1] : vector<8x32xf32> to vector<8xf32>
    %5 = vector.shape_cast %4 : vector<8xf32> to vector<8x1xf32>
    %cst_6 = arith.constant 3.200000e+01 : f32
    %6 = vector.broadcast %cst_6 : f32 to vector<8x1xf32>
    %7 = arith.divf %5, %6 : vector<8x1xf32>
    %8 = vector.broadcast %7 : vector<8x1xf32> to vector<8x32xf32>
    %9 = arith.subf %1, %8 : vector<8x32xf32>
    %10 = arith.mulf %9, %9 : vector<8x32xf32>
    %cst_7 = arith.constant dense<0.000000e+00> : vector<8xf32>
    %11 = vector.multi_reduction <add>, %10, %cst_7 [1] : vector<8x32xf32> to vector<8xf32>
    %12 = vector.shape_cast %11 : vector<8xf32> to vector<8x1xf32>
    %cst_8 = arith.constant 3.200000e+01 : f32
    %13 = vector.broadcast %cst_8 : f32 to vector<8x1xf32>
    %14 = arith.divf %12, %13 : vector<8x1xf32>
    %15 = vector.broadcast %7 : vector<8x1xf32> to vector<8x32xf32>
    %16 = arith.subf %1, %15 : vector<8x32xf32>
    %cst_9 = arith.constant 9.99999974E-6 : f32
    %17 = vector.broadcast %cst_9 : f32 to vector<8x1xf32>
    %18 = arith.addf %14, %17 : vector<8x1xf32>
    %19 = math.rsqrt %18 : vector<8x1xf32>
    %20 = vector.broadcast %19 : vector<8x1xf32> to vector<8x32xf32>
    %21 = arith.mulf %16, %20 : vector<8x32xf32>
    %22 = vector.broadcast %2 : vector<1x32xf32> to vector<8x32xf32>
    %23 = arith.mulf %21, %22 : vector<8x32xf32>
    %24 = vector.broadcast %3 : vector<1x32xf32> to vector<8x32xf32>
    %25 = arith.addf %23, %24 : vector<8x32xf32>
    %c0_10 = arith.constant 0 : index
    %c0_11 = arith.constant 0 : index
    %26 = vector.load %arg5[%c0_10, %c0_11] : memref<32x32xf32, #tpu.memory_space<vmem>>, vector<32x32xf32>
    %cst_12 = arith.constant dense<0.000000e+00> : vector<8x32xf32>
    %27 = tpu.matmul %25, %26, %cst_12 {dimension_numbers = #tpu.dot_dimension_numbers<[1], [0], [0], [1], [0, 0, 1, 1], [], []>} : vector<8x32xf32>, vector<32x32xf32>, vector<8x32xf32> -> vector<8x32xf32>
    %c0_13 = arith.constant 0 : index
    %c0_14 = arith.constant 0 : index
    %28 = vector.load %arg6[%c0_13, %c0_14] : memref<1x32xf32, #tpu.memory_space<vmem>>, vector<1x32xf32>
    %29 = vector.broadcast %28 : vector<1x32xf32> to vector<8x32xf32>
    %30 = arith.addf %27, %29 : vector<8x32xf32>
    %c0_15 = arith.constant 0 : index
    %c0_16 = arith.constant 0 : index
    %31 = vector.load %arg7[%c0_15, %c0_16] : memref<32x32xf32, #tpu.memory_space<vmem>>, vector<32x32xf32>
    %cst_17 = arith.constant dense<0.000000e+00> : vector<8x32xf32>
    %32 = tpu.matmul %25, %31, %cst_17 {dimension_numbers = #tpu.dot_dimension_numbers<[1], [0], [0], [1], [0, 0, 1, 1], [], []>} : vector<8x32xf32>, vector<32x32xf32>, vector<8x32xf32> -> vector<8x32xf32>
    %c0_18 = arith.constant 0 : index
    %c0_19 = arith.constant 0 : index
    %33 = vector.load %arg8[%c0_18, %c0_19] : memref<1x32xf32, #tpu.memory_space<vmem>>, vector<1x32xf32>
    %34 = vector.broadcast %33 : vector<1x32xf32> to vector<8x32xf32>
    %35 = arith.addf %32, %34 : vector<8x32xf32>
    %c0_20 = arith.constant 0 : index
    %c0_21 = arith.constant 0 : index
    %36 = vector.load %arg9[%c0_20, %c0_21] : memref<32x32xf32, #tpu.memory_space<vmem>>, vector<32x32xf32>
    %cst_22 = arith.constant dense<0.000000e+00> : vector<8x32xf32>
    %37 = tpu.matmul %25, %36, %cst_22 {dimension_numbers = #tpu.dot_dimension_numbers<[1], [0], [0], [1], [0, 0, 1, 1], [], []>} : vector<8x32xf32>, vector<32x32xf32>, vector<8x32xf32> -> vector<8x32xf32>
    %c0_23 = arith.constant 0 : index
    %c0_24 = arith.constant 0 : index
    %38 = vector.load %arg10[%c0_23, %c0_24] : memref<1x32xf32, #tpu.memory_space<vmem>>, vector<1x32xf32>
    %39 = vector.broadcast %38 : vector<1x32xf32> to vector<8x32xf32>
    %40 = arith.addf %37, %39 : vector<8x32xf32>
    %cst_25 = arith.constant 0.353553385 : f32
    %41 = vector.broadcast %cst_25 : f32 to vector<8x32xf32>
    %42 = arith.mulf %30, %41 : vector<8x32xf32>
    %c0_26 = arith.constant 0 : index
    %c0_27 = arith.constant 0 : index
    %c0_28 = arith.constant 0 : index
    %43 = vector.load %arg11[%c0_26, %c0_27, %c0_28] : memref<1x8x32xf32, #tpu.memory_space<vmem>>, vector<1x8x32xf32>
    %44 = vector.shape_cast %43 : vector<1x8x32xf32> to vector<8x32xf32>
    %45 = vector.shape_cast %42 : vector<8x32xf32> to vector<1x8x32xf32>
    tpu.vector_store %arg11[%c0_26, %c0_27, %c0_28], %45 {strides = array<i32>} : memref<1x8x32xf32, #tpu.memory_space<vmem>>, vector<1x8x32xf32>,
    %c0_29 = arith.constant 0 : index
    %c0_30 = arith.constant 0 : index
    %c0_31 = arith.constant 0 : index
    %46 = vector.load %arg12[%c0_29, %c0_30, %c0_31] : memref<1x8x32xf32, #tpu.memory_space<vmem>>, vector<1x8x32xf32>
    %47 = vector.shape_cast %46 : vector<1x8x32xf32> to vector<8x32xf32>
    %48 = vector.shape_cast %35 : vector<8x32xf32> to vector<1x8x32xf32>
    tpu.vector_store %arg12[%c0_29, %c0_30, %c0_31], %48 {strides = array<i32>} : memref<1x8x32xf32, #tpu.memory_space<vmem>>, vector<1x8x32xf32>,
    %c0_32 = arith.constant 0 : index
    %c0_33 = arith.constant 0 : index
    %c0_34 = arith.constant 0 : index
    %49 = vector.load %arg13[%c0_32, %c0_33, %c0_34] : memref<1x8x32xf32, #tpu.memory_space<vmem>>, vector<1x8x32xf32>
    %50 = vector.shape_cast %49 : vector<1x8x32xf32> to vector<8x32xf32>
    %51 = vector.shape_cast %40 : vector<8x32xf32> to vector<1x8x32xf32>
    tpu.vector_store %arg13[%c0_32, %c0_33, %c0_34], %51 {strides = array<i32>} : memref<1x8x32xf32, #tpu.memory_space<vmem>>, vector<1x8x32xf32>,
    return
  }
  func.func @transform_0(%arg0: i32, %arg1: i32) -> (i32, i32, i32) {
    %c0_i32 = arith.constant 0 : i32
    %c0_i32_0 = arith.constant 0 : i32
    return %arg0, %arg1, %c0_i32 : i32, i32, i32
  }
  func.func @transform_1(%arg0: i32, %arg1: i32) -> (i32, i32) {
    %c0_i32 = arith.constant 0 : i32
    %c0_i32_0 = arith.constant 0 : i32
    %c0_i32_1 = arith.constant 0 : i32
    return %c0_i32, %c0_i32_0 : i32, i32
  }
  func.func @transform_2(%arg0: i32, %arg1: i32) -> (i32, i32) {
    %c0_i32 = arith.constant 0 : i32
    %c0_i32_0 = arith.constant 0 : i32
    %c0_i32_1 = arith.constant 0 : i32
    return %c0_i32, %c0_i32_0 : i32, i32
  }
  func.func @transform_3(%arg0: i32, %arg1: i32) -> (i32, i32) {
    %c0_i32 = arith.constant 0 : i32
    %c0_i32_0 = arith.constant 0 : i32
    %c0_i32_1 = arith.constant 0 : i32
    return %c0_i32, %c0_i32_0 : i32, i32
  }
  func.func @transform_4(%arg0: i32, %arg1: i32) -> (i32, i32) {
    %c0_i32 = arith.constant 0 : i32
    %c0_i32_0 = arith.constant 0 : i32
    %c0_i32_1 = arith.constant 0 : i32
    return %c0_i32, %c0_i32_0 : i32, i32
  }
  func.func @transform_5(%arg0: i32, %arg1: i32) -> (i32, i32) {
    %c0_i32 = arith.constant 0 : i32
    %c0_i32_0 = arith.constant 0 : i32
    %c0_i32_1 = arith.constant 0 : i32
    return %c0_i32, %c0_i32_0 : i32, i32
  }
  func.func @transform_6(%arg0: i32, %arg1: i32) -> (i32, i32) {
    %c0_i32 = arith.constant 0 : i32
    %c0_i32_0 = arith.constant 0 : i32
    %c0_i32_1 = arith.constant 0 : i32
    return %c0_i32, %c0_i32_0 : i32, i32
  }
  func.func @transform_7(%arg0: i32, %arg1: i32) -> (i32, i32) {
    %c0_i32 = arith.constant 0 : i32
    %c0_i32_0 = arith.constant 0 : i32
    %c0_i32_1 = arith.constant 0 : i32
    return %c0_i32, %c0_i32_0 : i32, i32
  }
  func.func @transform_8(%arg0: i32, %arg1: i32) -> (i32, i32) {
    %c0_i32 = arith.constant 0 : i32
    %c0_i32_0 = arith.constant 0 : i32
    %c0_i32_1 = arith.constant 0 : i32
    return %c0_i32, %c0_i32_0 : i32, i32
  }
  func.func @transform_9(%arg0: i32, %arg1: i32) -> (i32, i32, i32) {
    %c0_i32 = arith.constant 0 : i32
    %c0_i32_0 = arith.constant 0 : i32
    return %arg0, %arg1, %c0_i32 : i32, i32, i32
  }
  func.func @transform_10(%arg0: i32, %arg1: i32) -> (i32, i32, i32) {
    %c0_i32 = arith.constant 0 : i32
    %c0_i32_0 = arith.constant 0 : i32
    return %arg0, %arg1, %c0_i32 : i32, i32, i32
  }
  func.func @transform_11(%arg0: i32, %arg1: i32) -> (i32, i32, i32) {
    %c0_i32 = arith.constant 0 : i32
    %c0_i32_0 = arith.constant 0 : i32
    return %arg0, %arg1, %c0_i32 : i32, i32, i32
  }
}

</mosaic_0001>

<bundles_post_ra>
// kernel: tpu_custom_call.1
= control target key start
LH: loop header
LB: loop body
LE: loop exit
PB: predicated region body
PF: predicated region fallthrough
CT: control target
= control target key end

     0   :  { %s1926_s0 = inlined_call_operand.hbm [shape: f32[2,8,32], index: 0, kind: input, shape index: {}]   ;;  %s1927_s1 = inlined_call_operand.vmem [shape: f32[1,32], index: 1, kind: input, shape index: {}]   ;;  %s1928_s2 = inlined_call_operand.vmem [shape: f32[1,32], index: 2, kind: input, shape index: {}]   ;;  %s1929_s3 = inlined_call_operand.hbm [shape: f32[32,32], index: 3, kind: input, shape index: {}]   ;;  %s1930_s4 = inlined_call_operand.vmem [shape: f32[1,32], index: 4, kind: input, shape index: {}]   ;;  %s1931_s5 = inlined_call_operand.hbm [shape: f32[32,32], index: 5, kind: input, shape index: {}]   ;;  %s1932_s6 = inlined_call_operand.vmem [shape: f32[1,32], index: 6, kind: input, shape index: {}]   ;;  %s1933_s7 = inlined_call_operand.hbm [shape: f32[32,32], index: 7, kind: input, shape index: {}]   ;;  %s1934_s8 = inlined_call_operand.vmem [shape: f32[1,32], index: 8, kind: input, shape index: {}]   ;;  %s1935_s9 = inlined_call_operand.hbm [shape: f32[2,8,32], index: 9, kind: output, shape index: {0}]   ;;  %s1936_s10 = inlined_call_operand.hbm [shape: f32[2,8,32], index: 10, kind: output, shape index: {1}]   ;;  %s1937_s11 = inlined_call_operand.hbm [shape: f32[2,8,32], index: 11, kind: output, shape index: {2}]  }
   0x1   :  { %1948 = sst [smem:[#allocation21_spill]] %s1926_s0 }
   0x2   :  { %1949 = sst [smem:[#allocation22_spill]] %s1927_s1 }
   0x3   :  { %1950 = sst [smem:[#allocation23_spill]] %s1928_s2 }
   0x4   :  { %1951 = sst [smem:[#allocation24_spill]] %s1932_s6 }
   0x5   :  { %1952 = sst [smem:[#allocation25_spill]] %s1934_s8 }
   0x6   :  { %1953 = sst [smem:[#allocation26_spill]] %s1935_s9 }
   0x7   :  { %1954 = sst [smem:[#allocation27_spill]] %s1936_s10 }
   0x8   :  { %1955 = sst [smem:[#allocation28_spill]] %s1937_s11 }
   0x9   :  { %17 = vsyncpa [#allocation3], 0 }
   0xa   :  { %19 = vsyncpa [#allocation3 + $0x1], 0 }
   0xb   :  { %20 = vsyncpa [#allocation6], 0 }
   0xc   :  { %21 = vsyncpa [#allocation9], 0 }
   0xd   :  { %22 = vsyncpa [#allocation4], 0 }
   0xe   :  { %24 = vsyncpa [#allocation4 + $0x1], 0 }
   0xf   :  { %25 = vsyncpa [#allocation12], 0 }
  0x10   :  { %27 = vsyncpa [#allocation12 + $0x1], 0  ;;  %s1539_s17 = smov 0   ;;  %s1541_s18 = smov 0  }
  0x11   :  { %s1543_s19 = smov 0   ;;  %s1545_s20 = smov 0  }
  0x12   :  { %s1547_s21 = smov 0   ;;  %s1549_s22 = smov 0  }
  0x13 LB: > { %1956 = sst [smem:[#allocation19_spill]] %s1445_s17  ;;  %s1570_s23 = sadd.s32 4294967295, %s1465_s22   ;;  %s1465_s22 = sphi %s1549_s22, %s33_s22   ;;  %s1461_s21 = sphi %s1547_s21, %s1992_s21   ;;  %s1457_s20 = sphi %s1545_s20, %s1991_s20   ;;  %s1453_s19 = sphi %s1543_s19, %s1990_s19   ;;  %s1449_s18 = sphi %s1541_s18, %s1989_s18   ;;  %s1445_s17 = sphi %s1539_s17, %s1988_s17  }
  0x14   : > { %s1938_s24 = sadd.s32 4294967294, %s1465_s22   ;;  %p67_p0 = scmp.ne.s32.totalorder %s1449_s18, %s1445_s17 }
  0x15   : > { %p1942_p1 = scmp.eq.s32.totalorder %s1570_s23, 0  ;;  %p267_p3 = scmp.eq.s32.totalorder %s1938_s24, 1 }
  0x16   : > { %p994_p5 = scmp.ge.s32.totalorder %s1465_s22, 1  ;;  %p330_p7 = scmp.lt.s32.totalorder %s1465_s22, 3 }
  0x17   : > { %p1581_p4 = por %p1942_p1, %p67_p0  ;;  %p1586_p6 = por %p267_p3, %p67_p0 }
  0x18   : > { %p1591_p8 = pnand %p994_p5, %p330_p7  ;;  %s1467_s28 = smov [#allocation5]  }
  0x19   : > { %s1957_s25 = scalar_select %p1581_p4, 1, 0 }
  0x1a   : > { %s1958_s26 = scalar_select %p1586_p6, 1, 0 }
  0x1b   : > { %s1960_s27 = scalar_select %p1591_p8, 1, 0 }
  0x1c   : > { %1959 = sst [smem:[#allocation20_spill]] %s1958_s26  ;;  %s348_s29 = sshll.u32 %s1467_s28, 4  ;;  %s1595_s29 = int_to_ptr.vmem [resolvable:$true] %s348_s29 }
  0x1d   : > { %p1111_p9 = pneg %p1591_p8  ;;  %s1468_s12 = smov [#allocation7]  }
  0x1e   : > { %s364_s13 = sshll.u32 %s1468_s12, 4  ;;  %s1469_s14 = smov [#allocation8]   ;;  %s1606_s13 = int_to_ptr.vmem [resolvable:$true] %s364_s13 }
  0x1f   : > { %p1602_p11 = pnand %p1111_p9, %p1942_p1  ;;  %s1608_s15 = sshll.u32 %s1469_s14, 4  ;;  %s381_s15 = int_to_ptr.vmem [resolvable:$true] %s1608_s15 }
  0x20   : > { %s1201_s24 = scalar_lea.hbm %s1929_s3, 512 }
  0x21   : > { %p1202_p12 = scmp.ne.s32.totalorder %s1929_s3, %s1201_s24  ;;  %p1618_p13 = pneg %p1602_p11 }
  0x22   : > { %p1208_p5 = scmp.lt.u32.totalorder %s1201_s24, %s1929_s3 }
  0x23   : > { %p1204_p0 = pnand %p1618_p13, %p1202_p12 }
  0x25   : > { %p1205_p3 = pneg %p1204_p0 }
  0x27   : > { %p1210_p7 = pnand %p1208_p5, %p1205_p3 }
  0x29   : > { %1213 = shalt.err (!%p1210_p7)
}
  0x2a   : > { %s1214_s17 = scalar_lea.vmem %s1595_s29, 512  ;;  %p1222_p2 = scmp.lt.s32.totalorder %s1595_s29, %s1595_s29 }
  0x2b   : > { %p1215_p9 = scmp.ne.s32.totalorder %s1595_s29, %s1214_s17  ;;  %p1223_p6 = scmp.lt.s32.totalorder %s1214_s17, %s1214_s17 }
  0x2d   : > { %p1217_p10 = pnand %p1215_p9, %p1618_p13  ;;  %p1224_p12 = por %p1223_p6, %p1222_p2 }
  0x2f   : > { %p1218_p1 = pneg %p1217_p10 }
  0x31   : > { %p1225_p0 = pnand %p1224_p12, %p1218_p1 }
  0x33   : > { %1228 = shalt.err (!%p1225_p0)
}
  0x34   : > { %s1470_s26 = smov 128   ;;  %s1471_s24 = smov 8  }
  0x35   : > { %1114 = dma.hbm_to_vmem [thread:$0]  (!%p1602_p11), %s1929_s3, 512, %s1595_s29, [#allocation6], %s1470_s26, %s1470_s26, %s1471_s24  }
  0x36   : > { %s1229_s17 = scalar_lea.hbm %s1931_s5, 512 }
  0x37   : > { %p1230_p1 = scmp.ne.s32.totalorder %s1931_s5, %s1229_s17  ;;  %p1236_p10 = scmp.lt.u32.totalorder %s1229_s17, %s1931_s5 }
  0x39   : > { %p1232_p2 = pnand %p1230_p1, %p1618_p13 }
  0x3b   : > { %p1233_p6 = pneg %p1232_p2 }
  0x3d   : > { %p1238_p3 = pnand %p1236_p10, %p1233_p6 }
  0x3f   : > { %1241 = shalt.err (!%p1238_p3)
}
  0x40   : > { %s1242_s29 = scalar_lea.vmem %s1606_s13, 512  ;;  %p1250_p12 = scmp.lt.s32.totalorder %s1606_s13, %s1606_s13 }
  0x41   : > { %p1243_p5 = scmp.ne.s32.totalorder %s1606_s13, %s1242_s29  ;;  %p1251_p0 = scmp.lt.s32.totalorder %s1242_s29, %s1242_s29 }
  0x43   : > { %p1245_p7 = pnand %p1243_p5, %p1618_p13  ;;  %p1252_p1 = por %p1251_p0, %p1250_p12 }
  0x45   : > { %p1246_p9 = pneg %p1245_p7 }
  0x47   : > { %p1253_p2 = pnand %p1252_p1, %p1246_p9 }
  0x49   : > { %1256 = shalt.err (!%p1253_p2)
}
  0x4a   : > { %1117 = dma.hbm_to_vmem [thread:$0]  (!%p1602_p11), %s1931_s5, 512, %s1606_s13, [#allocation6], %s1470_s26, %s1470_s26, %s1471_s24  }
  0x4b   : > { %s1257_s16 = scalar_lea.hbm %s1933_s7, 512 }
  0x4c   : > { %p1258_p6 = scmp.ne.s32.totalorder %s1933_s7, %s1257_s16  ;;  %p1264_p5 = scmp.lt.u32.totalorder %s1257_s16, %s1933_s7 }
  0x4e   : > { %p1260_p10 = pnand %p1258_p6, %p1618_p13 }
  0x50   : > { %p1261_p3 = pneg %p1260_p10 }
  0x52   : > { %p1266_p7 = pnand %p1264_p5, %p1261_p3 }
  0x54   : > { %1269 = shalt.err (!%p1266_p7)
}
  0x55   : > { %s1270_s29 = scalar_lea.vmem %s381_s15, 512  ;;  %p1278_p1 = scmp.lt.s32.totalorder %s381_s15, %s381_s15 }
  0x56   : > { %p1271_p9 = scmp.ne.s32.totalorder %s381_s15, %s1270_s29  ;;  %p1279_p2 = scmp.lt.s32.totalorder %s1270_s29, %s1270_s29 }
  0x58   : > { %p1273_p12 = pnand %p1271_p9, %p1618_p13  ;;  %p1280_p4 = por %p1279_p2, %p1278_p1 }
  0x5a   : > { %p1274_p0 = pneg %p1273_p12 }
  0x5c   : > { %p1281_p8 = pnand %p1280_p4, %p1274_p0 }
  0x5e   : > { %1284 = shalt.err (!%p1281_p8)
}
  0x5f   : > { %1120 = dma.hbm_to_vmem [thread:$0]  (!%p1602_p11), %s1933_s7, 512, %s381_s15, [#allocation9], %s1470_s26, %s1470_s26, %s1471_s24  }
  0x60   : > { %s54_s11 = sadd.s32 1, %s1453_s19  ;;  %s45_s30 = sadd.s32 1, %s1461_s21 }
  0x61   : > { %p61_p4 = scmp.ne.s32.totalorder %s1453_s19, %s1449_s18  ;;  %p47_p8 = scmp.ge.s32.totalorder %s45_s30, 2 }
  0x62   : > { %p62_p13 = scmp.eq.s32.totalorder %s1465_s22, 0  ;;  %p1963_p6 = scmp.eq.s32.totalorder %s1570_s23, 1 }
  0x63   : > { %p1138_p3 = scmp.lt.s32.totalorder %s1465_s22, 2  ;;  %s1994_s30 = smov (%p47_p8, %s45_s30), 0 }
  0x64   : > { %p1697_p10 = por %p1963_p6, %p61_p4  ;;  %p63_p5 = por %p62_p13, %p61_p4 }
  0x65   : > { %s397_s9 = sand.u32 1, %s1453_s19   ;;  %s49_s10 = ssub.s32 %s1461_s21, %s1994_s30 }
  0x66   : > { %p52_p7 = scmp.eq.s32.totalorder %s49_s10, 0  ;;  %s999_s15 = sshll.u32 %s397_s9, 3 }
  0x67   : > { %s1000_s26 = sshll.u32 %s1461_s21, 7  ;;  %s1965_s0 = sld [smem:[#allocation21_spill]] }
  0x68   : > { %s1709_s24 = scalar_select %p52_p7, %s1453_s19, %s54_s11  }
  0x69   : > { %s401_s14 = scalar_lea.vmem [#allocation2], %s999_s15  ;;  %p1720_p11 = pnand %p1138_p3, %p63_p5 }
  0x6a   : > { %s409_s17 = sshll.u32 %s401_s14, 4  ;;  %s398_s13 = scalar_lea.sflag [#allocation3], %s397_s9  ;;  %s1716_s17 = int_to_ptr.vmem [resolvable:$true] %s409_s17 }
  0x6b   : > { %p1287_p12 = pneg %p1720_p11 }
  0x6d   : > { %s1714_s12 = scalar_lea.hbm %s1965_s0, %s1000_s26  ;;  %s1290_s15 = scalar_lea.hbm %s1965_s0, 256 }
  0x6e   : > { %s1285_s6 = scalar_lea.hbm %s1714_s12, 128  ;;  %p1291_p2 = scmp.lt.u32.totalorder %s1714_s12, %s1965_s0 }
  0x6f   : > { %p1286_p9 = scmp.ne.s32.totalorder %s1714_s12, %s1285_s6  ;;  %p1292_p4 = scmp.lt.u32.totalorder %s1290_s15, %s1285_s6 }
  0x70   : > { %p1294_p13 = scmp.lt.u32.totalorder %s1285_s6, %s1714_s12 }
  0x71   : > { %p1288_p0 = pnand %p1287_p12, %p1286_p9  ;;  %p1293_p8 = por %p1292_p4, %p1291_p2 }
  0x73   : > { %p1289_p1 = pneg %p1288_p0  ;;  %p1295_p6 = por %p1294_p13, %p1293_p8 }
  0x75   : > { %p1296_p3 = pnand %p1295_p6, %p1289_p1 }
  0x77   : > { %1299 = shalt.err (!%p1296_p3)
}
  0x78   : > { %s1300_s9 = scalar_lea.vmem %s1716_s17, 128  ;;  %s1472_s28 = smov [#allocation2]  }
  0x79   : > { %p1301_p5 = scmp.ne.s32.totalorder %s1716_s17, %s1300_s9  ;;  %s1305_s14 = sshll.u32 %s1472_s28, 4  ;;  %s1306_s14 = int_to_ptr.vmem [resolvable:$false] %s1305_s14 }
  0x7a   : > { %s1307_s11 = scalar_lea.vmem %s1306_s14, 256  ;;  %p1308_p0 = scmp.lt.s32.totalorder %s1716_s17, %s1306_s14 }
  0x7b   : > { %p1303_p7 = pnand %p1301_p5, %p1287_p12  ;;  %p1309_p2 = scmp.lt.s32.totalorder %s1307_s11, %s1300_s9 }
  0x7d   : > { %p1304_p9 = pneg %p1303_p7  ;;  %p1310_p4 = por %p1309_p2, %p1308_p0 }
  0x7f   : > { %p1311_p8 = pnand %p1310_p4, %p1304_p9 }
  0x81   : > { %1314 = shalt.err (!%p1311_p8)
}
  0x82   : > { %1124 = dma.hbm_to_vmem [thread:$0]  (!%p1720_p11), %s1714_s12, 128, %s1716_s17, %s398_s13  }
  0x83   : > { %p1967_p1 = scmp.ne.s32.totalorder %s1960_s27, 0 }
  0x84   : > { %s1752_s6 = sand.u32 (!%p1967_p1), 1, %s1449_s18   ;;  %p1968_p12 = scmp.ne.s32.totalorder (!%p1967_p1), %s1957_s25, 0 }
  0x85   : > { %418 = sbr.rel (%p1967_p1) target bundleno = 738 (0x2e2), region = 56  ;;  %s1755_s10 = sshll.u32 (!%p1967_p1), %s1752_s6, 3 }
  0x86   : > { %s421_s15 = scalar_lea.sflag (!%p1967_p1), [#allocation3], %s1752_s6  ;;  %s424_s26 = scalar_lea.vmem (!%p1967_p1), [#allocation2], %s1755_s10 }
  0x8c   : > { %1424 = dma.done.wait (%p1968_p12), %s421_s15, 128  }
  0x8d   : > { %1426 = vsyncadd (%p1968_p12), %s421_s15, 4294967168  ;;  %p1969_p11 = scmp.eq.s32.totalorder %s1570_s23, 0 }
  0x8f   : > { %1428 = dma.done.wait (%p1969_p11), [#allocation6], 1024   ;;  %p1970_p13 = pmov %p1969_p11 }
  0x90   : > { %p1971_p6 = pmov %p1969_p11 }
  0x91   : > { %1430 = vsyncadd (%p1970_p13), [#allocation6], 4294966272 }
  0x92   : > { %1432 = dma.done.wait (%p1971_p6), [#allocation9], 512   ;;  %p1972_p3 = pmov %p1971_p6 }
  0x93   : > { %vm488_vm0 = vcmask 261120   ;;  %v485_v0 = vld [vmem:[%s424_s26] sm:$0xff]  ;;  %v517_v7 = vld [vmem:[#allocation5] sm:$0xff]  ;;  %v518_v8 = vld [vmem:[#allocation5 + $0x8] sm:$0xff]  ;;  %v1473_v10 = vmov 0.0|0.0   ;;  %vm1474_vm1 = vmmov 0  }
  0x94   : > { %1434 = vsyncadd (%p1972_p3), [#allocation9], 4294966784  ;;  %v489_v1 = vsel %vm488_vm0, %v485_v0, 0.0  ;;  %v601_v9 = vld [vmem:[#allocation7] sm:$0xff]  ;;  %1073 = vmatprep.subr.bf16.mxu0 %v1473_v10  ;;  %v1074_v11 = vpack.c.bf16 %v518_v8, %v517_v7  ;;  %1079 = vmatprep.subr.bf16.mxu1 %v1473_v10  ;;  %v602_v12 = vld [vmem:[#allocation7 + $0x8] sm:$0xff]  ;;  %v1475_v18 = vmov 0.0  }
  0x95   : > { %490 = vadd.xlane.f32.xlu0 %v489_v1  ;;  %v519_v13 = vld [vmem:[#allocation5 + $0x10] sm:$0xff]  ;;  %v520_v14 = vld [vmem:[#allocation5 + $0x18] sm:$0xff]  ;;  %v1080_v15 = vpack.c.bf16 %v602_v12, %v601_v9  ;;  %1048 = vmatprep.mubr.msk.f32.mxu0 %vm1474_vm1, %v1475_v18  ;;  %s1973_s1 = sld [smem:[#allocation22_spill]]  ;;  %v682_v27 = vld [vmem:[#allocation8] sm:$0xff]  ;;  %s1974_s2 = sld [smem:[#allocation23_spill]] }
  0x96   : > { %v603_v16 = vld [vmem:[#allocation7 + $0x10] sm:$0xff]  ;;  %v604_v17 = vld [vmem:[#allocation7 + $0x18] sm:$0xff]  ;;  %1059 = vmatprep.mubr.msk.f32.mxu1 %vm1474_vm1, %v1475_v18  ;;  %1075 = vmatpush3.bf16.msra.mxu0 %v1074_v11  ;;  %v1077_v19 = vpack.c.bf16 %v520_v14, %v519_v13  ;;  %v683_v28 = vld [vmem:[#allocation8 + $0x8] sm:$0xff]  ;;  %s772_s29 = sand.u32 1, %s1570_s23   ;;  %s1975_s14 = sld [smem:[#allocation24_spill]] }
  0x97   : > { %1081 = vmatpush3.bf16.msra.mxu1 %v1080_v15  ;;  %1076 = vmatprep.subr.bf16.mxu0 %v1473_v10  ;;  %v1083_v20 = vpack.c.bf16 %v604_v17, %v603_v16  ;;  %v1086_v31 = vpack.c.bf16 %v683_v28, %v682_v27  ;;  %v684_v33 = vld [vmem:[#allocation8 + $0x10] sm:$0xff]  ;;  %v685_v34 = vld [vmem:[#allocation8 + $0x18] sm:$0xff]  ;;  %s1793_s11 = sshll.u32 %s1457_s20, 7  ;;  %s477_s15 = scalar_lea.vmem [#allocation11], %s1755_s10 }
  0x98   : > { %1082 = vmatprep.subr.bf16.mxu1 %v1473_v10  ;;  %v1089_v35 = vpack.c.bf16 %v685_v34, %v684_v33  ;;  %v1011_v36 = vld [vmem:[%s1930_s4] ss:$0 sm:$0xff]  ;;  %s806_s26 = sshll.u32 %s477_s15, 4  ;;  %s1947_s25 = scalar_lea.vmem [#allocation10], %s1755_s10  ;;  %s1805_s26 = int_to_ptr.vmem [resolvable:$true] %s806_s26 }
  0x99   : > { %s792_s23 = sshll.u32 %s1947_s25, 4  ;;  %s1976_s17 = sld [smem:[#allocation27_spill]]  ;;  %s1814_s23 = int_to_ptr.vmem [resolvable:$true] %s792_s23 }
  0x9a   : > { %1078 = vmatpush3.bf16.msra.mxu0 %v1077_v19  ;;  %s1978_s28 = sld [smem:[#allocation26_spill]]  ;;  %s1816_s25 = scalar_lea.sflag [#allocation12], %s772_s29 }
  0x9b   : > { %1084 = vmatpush3.bf16.msra.mxu1 %v1083_v20  ;;  %1085 = vmatprep.subr.bf16.mxu0 %v1473_v10  ;;  %v1009_v25 = vld [vmem:[%s1973_s1] ss:$0 sm:$0xff]  ;;  %s1315_s27 = scalar_lea.vmem %s1805_s26, 128  ;;  %s1476_s12 = smov [#allocation11]  }
  0x9c   : > { %v1010_v29 = vld [vmem:[%s1974_s2] ss:$0 sm:$0xff]  ;;  %p1316_p5 = scmp.ne.s32.totalorder %s1805_s26, %s1315_s27 }
  0x9d   : > { %v1013_v37 = vld [vmem:[%s1975_s14] ss:$0 sm:$0xff] }
  0x9e   : > { %p1317_p7 = pnand %p1316_p5, %p1697_p10 }
  0x9f   : > { %s1977_s13 = smov %s1976_s17  ;;  %s1803_s16 = scalar_lea.hbm %s1976_s17, %s1793_s11 }
  0xa0   : > { %s1812_s14 = scalar_lea.hbm %s1978_s28, %s1793_s11  ;;  %p1318_p9 = pneg %p1317_p7 }
  0xa1   : > { %s1319_s17 = sshll.u32 %s1476_s12, 4  ;;  %s1320_s17 = int_to_ptr.vmem [resolvable:$false] %s1319_s17 }
  0xa2   : > { %s1321_s0 = scalar_lea.vmem %s1320_s17, 256  ;;  %p1322_p0 = scmp.lt.s32.totalorder %s1805_s26, %s1320_s17 }
  0xa3   : > { %p1323_p2 = scmp.lt.s32.totalorder %s1321_s0, %s1315_s27 }
  0xa5   : > { %p1324_p4 = por %p1323_p2, %p1322_p0 }
  0xa7   : > { %p1325_p8 = pnand %p1324_p4, %p1318_p9 }
 0x122   : > { %v491_v2 = vpop.xlane.xlu0 %490 }
 0x123   : > { %v493_v3 = vmul.f32 0.03125, %v491_v2 }
 0x125   : > { %v494_v4 = vsub.f32 %v485_v0, %v493_v3 }
 0x127   : > { %v495_v5 = vmul.f32 %v494_v4, %v494_v4 }
 0x129   : > { %v496_v6 = vsel %vm488_vm0, %v495_v5, 0.0 }
 0x12a   : > { %497 = vadd.xlane.f32.xlu0 %v496_v6 }
 0x1b7   : > { %v498_v21 = vpop.xlane.xlu0 %497 }
 0x1b8   : > { %v499_v22 = vmul.f32 0.03125, %v498_v21 }
 0x1ba   : > { %v500_v23 = vadd.f32 1e-05, %v499_v22 }
 0x1bc   : > { %1199 = vrsqrt.f32 %v500_v23 }
 0x1c6   : > { %v1200_v24 = vpop.eup %1199 }
 0x1c7   : > { %v502_v26 = vmul.f32 %v1200_v24, %v494_v4 }
 0x1c9   : > { %v509_v30 = vmul.f32 %v1009_v25, %v502_v26 }
 0x1cb   : > { %v516_v32 = vadd.f32 %v1010_v29, %v509_v30 }
 0x1cd   : > { %1049 = vmatmul.mubr.msk.f32.vlgmr.msra.gmra.mrb[0].mxu0 %vm488_vm0, %v516_v32  ;;  %1060 = vmatmul.mubr.msk.f32.vlgmr.msra.gmra.mrb[0].mxu1 %vm488_vm0, %v516_v32 }
 0x1ce   : > { %1087 = vmatpush3.bf16.msra.mxu0 %v1086_v31  ;;  %1070 = vmatprep.mubr.msk.f32.mxu0 %vm1474_vm1, %v1475_v18 }
 0x1cf   : > { %1088 = vmatprep.subr.bf16.mxu0 %v1473_v10 }
 0x1d2   : > { %1090 = vmatpush3.bf16.msra.mxu0 %v1089_v35 }
 0x1d5   : > { %1071 = vmatmul.mubr.msk.f32.vlgmr.msra.gmra.mrb[2].mxu0 %vm488_vm0, %v516_v32 }
 0x2a0   : > { %v597_v38 = vpop.f32.mrb[0].mxu0  ;;  %v678_v39 = vpop.f32.mrb[0].mxu1 }
 0x2a1   : > { %v598_v40 = vadd.f32 %v1011_v36, %v597_v38  ;;  %v679_v41 = vadd.f32 %v1013_v37, %v678_v39  ;;  %v1050_v42 = vpop.f32.mrb[1].mxu0  ;;  %v1061_v43 = vpop.f32.mrb[1].mxu1 }
 0x2a3   : > { %v763_v44 = vmul.f32 0.35355338, %v598_v40  ;;  %765 = vst.msk [vmem:[%s477_s15] sm:$0xff] %vm488_vm0, %v679_v41 }
 0x2a4   : > { %1328 = shalt.err (!%p1325_p8)
}
 0x2a5   : > { %s1329_s29 = scalar_lea.hbm %s1803_s16, 128  ;;  %s1333_s9 = scalar_lea.hbm %s1977_s13, 256 }
 0x2a6   : > { %p1330_p1 = scmp.ne.s32.totalorder %s1803_s16, %s1329_s29  ;;  %p1334_p13 = scmp.lt.u32.totalorder %s1803_s16, %s1977_s13 }
 0x2a7   : > { %p1335_p6 = scmp.lt.u32.totalorder %s1333_s9, %s1329_s29  ;;  %p1337_p5 = scmp.lt.u32.totalorder %s1329_s29, %s1803_s16 }
 0x2a8   : > { %p1331_p12 = pnand %p1330_p1, %p1697_p10 }
 0x2a9   : > { %p1336_p3 = por %p1335_p6, %p1334_p13 }
 0x2aa   : > { %p1332_p11 = pneg %p1331_p12 }
 0x2ab   : > { %p1338_p7 = por %p1337_p5, %p1336_p3 }
 0x2ad   : > { %p1339_p9 = pnand %p1338_p7, %p1332_p11 }
 0x2af   : > { %1342 = shalt.err (!%p1339_p9)
}
 0x2b0   : > { %1106 = dma.vmem_to_hbm [thread:$0]  (%p1697_p10), %s1805_s26, 128, %s1803_s16, %s1816_s25  }
 0x2b1   : > { %s1979_s0 = scalar_lea.vmem [#allocation10], %s1755_s10  ;;  %s484_s27 = scalar_lea.vmem [#allocation13], %s1755_s10 }
 0x2b2   : > { %764 = vst.msk [vmem:[%s1979_s0] sm:$0xff] %vm488_vm0, %v763_v44  ;;  %s1846_s29 = sshll.u32 %s484_s27, 4  ;;  %s1980_s9 = sld [smem:[#allocation25_spill]]  ;;  %s821_s29 = int_to_ptr.vmem [resolvable:$true] %s1846_s29 }
 0x2b3   : > { %s768_s12 = scalar_lea.sflag [#allocation4], %s1752_s6  ;;  %s1343_s17 = scalar_lea.vmem %s1814_s23, 128 }
 0x2b4   : > { %p1344_p0 = scmp.ne.s32.totalorder %s1814_s23, %s1343_s17  ;;  %s1477_s1 = smov [#allocation10]  }
 0x2b5   : > { %s1347_s2 = sshll.u32 %s1477_s1, 4  ;;  %s1348_s2 = int_to_ptr.vmem [resolvable:$false] %s1347_s2 }
 0x2b6   : > { %p1345_p2 = pnand %p1344_p0, %p1697_p10  ;;  %s1349_s26 = scalar_lea.vmem %s1348_s2, 256 }
 0x2b7   : > { %p1350_p8 = scmp.lt.s32.totalorder %s1814_s23, %s1348_s2  ;;  %p1351_p1 = scmp.lt.s32.totalorder %s1349_s26, %s1343_s17 }
 0x2b8   : > { %v1015_v45 = vld [vmem:[%s1980_s9] ss:$0 sm:$0xff]  ;;  %p1346_p4 = pneg %p1345_p2 }
 0x2b9   : > { %p1352_p12 = por %p1351_p1, %p1350_p8 }
 0x2bb   : > { %p1353_p11 = pnand %p1352_p12, %p1346_p4 }
 0x2bd   : > { %1356 = shalt.err (!%p1353_p11)
}
 0x2be   : > { %s1357_s6 = scalar_lea.hbm %s1812_s14, 128  ;;  %s1361_s1 = scalar_lea.hbm %s1978_s28, 256 }
 0x2bf   : > { %p1358_p13 = scmp.ne.s32.totalorder %s1812_s14, %s1357_s6  ;;  %p1362_p5 = scmp.lt.u32.totalorder %s1812_s14, %s1978_s28 }
 0x2c0   : > { %p1363_p7 = scmp.lt.u32.totalorder %s1361_s1, %s1357_s6  ;;  %p1365_p0 = scmp.lt.u32.totalorder %s1357_s6, %s1812_s14 }
 0x2c1   : > { %p1359_p6 = pnand %p1358_p13, %p1697_p10 }
 0x2c2   : > { %p1364_p9 = por %p1363_p7, %p1362_p5 }
 0x2c3   : > { %p1360_p3 = pneg %p1359_p6 }
 0x2c4   : > { %p1366_p2 = por %p1365_p0, %p1364_p9 }
 0x2c6   : > { %p1367_p4 = pnand %p1366_p2, %p1360_p3 }
 0x2c8   : > { %1370 = shalt.err (!%p1367_p4)
}
 0x2c9   : > { %1105 = dma.vmem_to_hbm [thread:$0]  (%p1697_p10), %s1814_s23, 128, %s1812_s14, %s768_s12   ;;  %v759_v46 = vpop.f32.mrb[2].mxu0 }
 0x2ca   : > { %v760_v47 = vadd.f32 %v1015_v45, %v759_v46  ;;  %v1072_v48 = vpop.f32.mrb[3].mxu0  ;;  %s1981_s17 = sld [smem:[#allocation28_spill]]  ;;  %s1371_s6 = scalar_lea.vmem %s821_s29, 128 }
 0x2cb   : > { %p1372_p8 = scmp.ne.s32.totalorder %s821_s29, %s1371_s6  ;;  %s1478_s0 = smov [#allocation13]  }
 0x2cc   : > { %766 = vst.msk [vmem:[%s484_s27] sm:$0xff] %vm488_vm0, %v760_v47  ;;  %s1375_s1 = sshll.u32 %s1478_s0, 4  ;;  %s1376_s1 = int_to_ptr.vmem [resolvable:$false] %s1375_s1 }
 0x2cd   : > { %p1373_p1 = pnand %p1372_p8, %p1697_p10  ;;  %s1377_s23 = scalar_lea.vmem %s1376_s1, 256 }
 0x2ce   : > { %p1378_p11 = scmp.lt.s32.totalorder %s821_s29, %s1376_s1  ;;  %p1379_p13 = scmp.lt.s32.totalorder %s1377_s23, %s1371_s6 }
 0x2cf   : > { %p1374_p12 = pneg %p1373_p1 }
 0x2d0   : > { %s1982_s26 = smov %s1981_s17  ;;  %s1877_s16 = scalar_lea.hbm %s1981_s17, %s1793_s11 }
 0x2d1   : > { %p1380_p6 = por %p1379_p13, %p1378_p11 }
 0x2d3   : > { %p1381_p3 = pnand %p1380_p6, %p1374_p12 }
 0x2d5   : > { %1384 = shalt.err (!%p1381_p3)
}
 0x2d6   : > { %s1385_s10 = scalar_lea.hbm %s1877_s16, 128  ;;  %s1389_s27 = scalar_lea.hbm %s1982_s26, 256 }
 0x2d7   : > { %p1386_p5 = scmp.ne.s32.totalorder %s1877_s16, %s1385_s10  ;;  %p1390_p0 = scmp.lt.u32.totalorder %s1877_s16, %s1982_s26 }
 0x2d8   : > { %p1391_p2 = scmp.lt.u32.totalorder %s1389_s27, %s1385_s10  ;;  %p1393_p8 = scmp.lt.u32.totalorder %s1385_s10, %s1877_s16 }
 0x2d9   : > { %p1387_p7 = pnand %p1386_p5, %p1697_p10 }
 0x2da   : > { %p1392_p4 = por %p1391_p2, %p1390_p0 }
 0x2db   : > { %p1388_p9 = pneg %p1387_p7 }
 0x2dc   : > { %p1394_p1 = por %p1393_p8, %p1392_p4 }
 0x2de   : > { %p1395_p12 = pnand %p1394_p1, %p1388_p9 }
 0x2e0   : > { %1398 = shalt.err (!%p1395_p12)
}
 0x2e1   : > { %1107 = dma.vmem_to_hbm [thread:$0]  (%p1697_p10), %s821_s29, 128, %s1877_s16, %s1816_s25  }
 0x2e2 PF: > { %s1983_s2 = sld [smem:[#allocation19_spill]]  ;;  %s1984_s20 = sld [smem:[#allocation20_spill]] }
 0x2e3   : > { %p1986_p13 = scmp.ge.s32.totalorder %s1465_s22, 2 }
 0x2e8   : > { %s832_s9 = sand.u32 1, %s1983_s2   ;;  %p1985_p11 = scmp.ne.s32.totalorder %s1984_s20, 0 }
 0x2e9   : > { %s833_s17 = scalar_lea.sflag [#allocation4], %s832_s9 }
 0x2ea   : > { %p1126_p6 = pnand %p1986_p13, %p1985_p11 }
 0x2ec   : > { %1436 = dma.done.wait (!%p1126_p6), %s833_s17, 128  }
 0x2ed   : > { %1438 = vsyncadd (!%p1126_p6), %s833_s17, 4294967168  ;;  %s1987_s6 = sadd.s32 4294967294, %s1465_s22  }
 0x2ee   : > { %s841_s0 = sand.u32 1, %s1987_s6  }
 0x2ef   : > { %s842_s1 = scalar_lea.sflag [#allocation12], %s841_s0 }
 0x2f0   : > { %1440 = dma.done.wait (!%p1126_p6), %s842_s1, 256  }
 0x2f1   : > { %1442 = vsyncadd (!%p1126_p6), %s842_s1, 4294967040  ;;  %s33_s22 = sadd.s32 1, %s1465_s22   ;;  %s1988_s17 = smov %s1449_s18 }
 0x2f2   : > { %p30_p10 = scmp.ge.s32.totalorder %s33_s22, 4   ;;  %s1989_s18 = smov %s1453_s19 }
 0x2f3   : > { %s1990_s19 = smov %s1709_s24  ;;  %s1991_s20 = smov %s1461_s21 }
 0x2f4   : > { %s1992_s21 = smov %s1994_s30  ;;  %32 = sbr.rel (!%p30_p10) target bundleno = 19 (0x13), region = 145 }
 0x2fb   :  { %856 = vsyncpa [#allocation3], 1 }
 0x2fc   :  { %858 = vsyncpa [#allocation3 + $0x1], 1 }
 0x2fd   :  { %859 = vsyncpa [#allocation6], 1 }
 0x2fe   :  { %860 = vsyncpa [#allocation9], 1 }
 0x2ff   :  { %861 = vsyncpa [#allocation4], 1 }
 0x300   :  { %863 = vsyncpa [#allocation4 + $0x1], 1 }
 0x301   :  { %864 = vsyncpa [#allocation12], 1 }
 0x302   :  { %866 = vsyncpa [#allocation12 + $0x1], 1 }

</bundles_post_ra>
